<compile_context>
chip_gen: v7x
topology: tpu7x:2x2x1
jax: 0.10.0
libtpu: 0.0.40
codegen_flags: <defaults>
</compile_context>

<pallas_src>
import functools

import jax
import jax.numpy as jnp
from jax import lax
from jax.experimental import pallas as pl
from jax.experimental.pallas import tpu as pltpu

_BIAS_ROWS = 8  # sublane-aligned bias block appended to the folded weight matrix


def prepare_ensemble(w, b, *, lane_multiple=128):
    """Fold the stacked member heads into one lane-dense matmul operand.

    Run once per checkpoint (hoists all per-call weight prep out of the forward
    path).  Returns w_aug of shape [M*D + 8, C_pad] where
      rows [0, M*D)      : W reshaped to (M*D, C)   (member axis folded into K)
      row  M*D           : sum_m b[m]               (selected by the bias lane)
      rows (M*D, M*D+8)  : zeros                    (sublane padding)
    and C_pad = round_up(C, lane_multiple) so the kernel's output is lane-dense.
    """
    M, D, C = w.shape
    c_pad = ((C + lane_multiple - 1) // lane_multiple) * lane_multiple
    w_flat = w.reshape(M * D, C)
    # Member bias sum in f32, then back to the checkpoint dtype for the MXU.
    b_sum = jnp.sum(b.astype(jnp.float32), axis=0, keepdims=True).astype(w.dtype)  # [1, C]
    bias_block = jnp.concatenate(
        [b_sum, jnp.zeros((_BIAS_ROWS - 1, C), w.dtype)], axis=0)                  # [8, C]
    w_aug = jnp.concatenate([w_flat, bias_block], axis=0)                          # [M*D+8, C]
    if c_pad != C:
        w_aug = jnp.pad(w_aug, ((0, 0), (0, c_pad - C)))                           # [M*D+8, C_pad]
    return w_aug


def _ensemble_kernel(x_ref, w_ref, o_ref, *, num_members):
    # x_ref: [TB, D] (native dtype), w_ref: [M*D + 8, C_pad], o_ref: [TB, C_pad].
    x = x_ref[...]
    tb = x.shape[0]

    # Replicate x M times along lanes so the MXU's K-reduction also sums the
    # ensemble members (lane concat is cheap VPU/vreg work, no extra HBM traffic).
    x_rep = jnp.concatenate([x] * num_members, axis=1)                   # [TB, M*D]
    # One-hot "bias lane" block: lane 0 selects the pre-summed bias row of w_aug,
    # the remaining 7 lanes hit the zero padding rows.
    tail = (lax.broadcasted_iota(jnp.int32, (tb, _BIAS_ROWS), 1) == 0).astype(x.dtype)
    x_aug = jnp.concatenate([x_rep, tail], axis=1)                       # [TB, M*D+8]

    # Single MXU pass, native-dtype operands, f32 accumulation:
    #   sum_m (x @ W[m]) + sum_m b[m]
    acc = jnp.dot(x_aug, w_ref[...], preferred_element_type=jnp.float32)  # [TB, C_pad]

    # 1/M on the small result slab turns the sums into means; lane-dense store.
    o_ref[...] = (acc * (1.0 / num_members)).astype(o_ref.dtype)


def ensemble_forward(x, w_aug, *, num_members, num_classes, block_b=256):
    """x: [B, D], w_aug: [M*D + 8, C_pad] from prepare_ensemble -> [B, C]."""
    B, D = x.shape
    k_aug, c_pad = w_aug.shape
    assert k_aug == num_members * D + _BIAS_ROWS, (k_aug, num_members, D)

    tb = B if B <= block_b else block_b
    grid = (pl.cdiv(B, tb),)

    out = pl.pallas_call(
        functools.partial(_ensemble_kernel, num_members=num_members),
        out_shape=jax.ShapeDtypeStruct((B, c_pad), x.dtype),
        grid=grid,
        in_specs=[
            pl.BlockSpec((tb, D), lambda i: (i, 0)),          # x tile (per batch block)
            pl.BlockSpec((k_aug, c_pad), lambda i: (0, 0)),   # folded weights, resident
        ],
        out_specs=pl.BlockSpec((tb, c_pad), lambda i: (i, 0)),
        compiler_params=pltpu.CompilerParams(
            # Batch axis is independent -> shards across both v7x TensorCores;
            # neutral (single step) at the toy shape and on 1-TC chips.
            dimension_semantics=("parallel",),
        ),
    )(x, w_aug)
    # Drop the lane padding back to the true class count.
    return out[:, :num_classes]


if __name__ == "__main__":
    key = jax.random.PRNGKey(0)
    B, D, C, M = 8, 32, 16, 4  # batch, in_features, num_classes, ensemble members

    kx, kw, kb = jax.random.split(key, 3)
    x = jax.random.normal(kx, (B, D), dtype=jnp.float32)
    # Deterministic synthetic "checkpoint": per-member linear weights and biases.
    w = jax.random.normal(kw, (M, D, C), dtype=jnp.float32) * 0.1
    b = jax.random.normal(kb, (M, C), dtype=jnp.float32) * 0.1

    # One-time (per checkpoint) prep, hoisted out of the per-call forward path.
    w_aug = prepare_ensemble(w, b)

    out = jax.block_until_ready(
        ensemble_forward(x, w_aug, num_members=M, num_classes=C))

    # Pure-JAX reference of EnsembleModel.forward: mean over stacked member logits.
    ref = jnp.mean(jnp.einsum("bd,mdc->mbc", x, w) + b[:, None, :], axis=0)

    assert out.shape == (B, C), out.shape
    assert jnp.allclose(out, ref, atol=1e-5, rtol=1e-5), float(jnp.max(jnp.abs(out - ref)))
    print("KERNEL_OK")
</pallas_src>

<mosaic_0001>
module attributes {stable_mosaic.version = 11 : i64} {
  func.func @_ensemble_kernel(%arg0: i32, %arg1: memref<8x32xf32, #tpu.memory_space<vmem>>, %arg2: memref<136x128xf32, #tpu.memory_space<vmem>>, %arg3: memref<8x128xf32, #tpu.memory_space<vmem>>) attributes {dimension_semantics = [#tpu.dimension_semantics<parallel>], iteration_bounds = array<i64: 1>, scalar_prefetch = 0 : i64, scratch_operands = 0 : i64, tpu.core_type = #tpu.core_type<tc>, window_params = [{transform_indices = @transform_0, window_bounds = array<i64: 8, 32>}, {pipeline_mode = #tpu.pipeline_mode<synchronous>, transform_indices = @transform_1, window_bounds = array<i64: 136, 128>}, {transform_indices = @transform_2, window_bounds = array<i64: 8, 128>}]} {
    %c0 = arith.constant 0 : index
    %c0_0 = arith.constant 0 : index
    %0 = vector.load %arg1[%c0, %c0_0] : memref<8x32xf32, #tpu.memory_space<vmem>>, vector<8x32xf32>
    %1 = tpu.concatenate %0, %0, %0, %0 in 1 : vector<8x32xf32>, vector<8x32xf32>, vector<8x32xf32>, vector<8x32xf32> -> vector<8x128xf32>
    %2 = tpu.iota {dimensions = array<i32: 1>} : vector<8x8xi32>
    %c0_i32 = arith.constant 0 : i32
    %3 = vector.broadcast %c0_i32 : i32 to vector<8x8xi32>
    %4 = arith.cmpi eq, %2, %3 : vector<8x8xi32>
    %5 = arith.extui %4 : vector<8x8xi1> to vector<8x8xi32>
    %6 = arith.sitofp %5 : vector<8x8xi32> to vector<8x8xf32>
    %7 = tpu.concatenate %1, %6 in 1 : vector<8x128xf32>, vector<8x8xf32> -> vector<8x136xf32>
    %c0_1 = arith.constant 0 : index
    %c0_2 = arith.constant 0 : index
    %8 = vector.load %arg2[%c0_1, %c0_2] : memref<136x128xf32, #tpu.memory_space<vmem>>, vector<136x128xf32>
    %cst = arith.constant dense<0.000000e+00> : vector<8x128xf32>
    %9 = tpu.matmul %7, %8, %cst {dimension_numbers = #tpu.dot_dimension_numbers<[1], [0], [0], [1], [0, 0, 1, 1], [], []>} : vector<8x136xf32>, vector<136x128xf32>, vector<8x128xf32> -> vector<8x128xf32>
    %cst_3 = arith.constant 2.500000e-01 : f32
    %10 = vector.broadcast %cst_3 : f32 to vector<8x128xf32>
    %11 = arith.mulf %9, %10 : vector<8x128xf32>
    %c0_4 = arith.constant 0 : index
    %c0_5 = arith.constant 0 : index
    %12 = vector.load %arg3[%c0_4, %c0_5] : memref<8x128xf32, #tpu.memory_space<vmem>>, vector<8x128xf32>
    tpu.vector_store %arg3[%c0_4, %c0_5], %11 {strides = array<i32>} : memref<8x128xf32, #tpu.memory_space<vmem>>, vector<8x128xf32>,
    return
  }
  func.func @transform_0(%arg0: i32) -> (i32, i32) {
    %c0_i32 = arith.constant 0 : i32
    %c0_i32_0 = arith.constant 0 : i32
    return %arg0, %c0_i32 : i32, i32
  }
  func.func @transform_1(%arg0: i32) -> (i32, i32) {
    %c0_i32 = arith.constant 0 : i32
    %c0_i32_0 = arith.constant 0 : i32
    %c0_i32_1 = arith.constant 0 : i32
    return %c0_i32, %c0_i32_0 : i32, i32
  }
  func.func @transform_2(%arg0: i32) -> (i32, i32) {
    %c0_i32 = arith.constant 0 : i32
    %c0_i32_0 = arith.constant 0 : i32
    return %arg0, %c0_i32 : i32, i32
  }
}

</mosaic_0001>

<bundles_post_ra>
// kernel: tpu_custom_call.1
= control target key start
LH: loop header
LB: loop body
LE: loop exit
PB: predicated region body
PF: predicated region fallthrough
CT: control target
= control target key end

     0   :  { %7 = vsyncpa [#allocation3], 0  ;;  %s345_s0 = inlined_call_operand.hbm [shape: f32[8,32], index: 0, kind: input, shape index: {}]   ;;  %s346_s1 = inlined_call_operand.hbm [shape: f32[136,128], index: 1, kind: input, shape index: {}]   ;;  %s347_s2 = inlined_call_operand.hbm [shape: f32[8,128], index: 2, kind: output, shape index: {}]  }
   0x1   :  { %8 = vsyncpa [#allocation6], 0 }
   0x2   :  { %9 = vsyncpa [#allocation4], 0  ;;  %s277_s9 = smov [#allocation2]   ;;  %s278_s11 = smov [#allocation5]  }
   0x3   :  { %s16_s10 = sshll.u32 %s277_s9, 4  ;;  %s25_s12 = sshll.u32 %s278_s11, 4  ;;  %s17_s10 = int_to_ptr.vmem [resolvable:$true] %s16_s10  ;;  %s302_s12 = int_to_ptr.vmem [resolvable:$true] %s25_s12 }
   0x4   :  { %s205_s15 = scalar_lea.hbm %s345_s0, 128 }
   0x5   :  { %p206_p0 = scmp.ne.s32.totalorder %s345_s0, %s205_s15  ;;  %p209_p1 = scmp.lt.u32.totalorder %s205_s15, %s345_s0 }
   0x7   :  { %p211_p2 = pnand %p209_p1, %p206_p0 }
   0x9   :  { %214 = shalt.err (!%p211_p2)
}
   0xa   :  { %s215_s20 = scalar_lea.vmem %s17_s10, 128  ;;  %p220_p4 = scmp.lt.s32.totalorder %s17_s10, %s17_s10 }
   0xb   :  { %p216_p3 = scmp.ne.s32.totalorder %s17_s10, %s215_s20  ;;  %p221_p5 = scmp.lt.s32.totalorder %s215_s20, %s215_s20 }
   0xd   :  { %p222_p6 = por %p221_p5, %p220_p4 }
   0xf   :  { %p223_p7 = pnand %p222_p6, %p216_p3 }
  0x11   :  { %226 = shalt.err (!%p223_p7)
}
  0x12   :  { %19 = dma.hbm_to_vmem [thread:$0]  %s345_s0, 128, %s17_s10, [#allocation3]  }
  0x13   :  { %s227_s25 = scalar_lea.hbm %s346_s1, 2176 }
  0x14   :  { %p228_p8 = scmp.ne.s32.totalorder %s346_s1, %s227_s25  ;;  %p231_p9 = scmp.lt.u32.totalorder %s227_s25, %s346_s1 }
  0x16   :  { %p233_p10 = pnand %p231_p9, %p228_p8 }
  0x18   :  { %236 = shalt.err (!%p233_p10)
}
  0x19   :  { %s237_s30 = scalar_lea.vmem %s302_s12, 2176  ;;  %p242_p12 = scmp.lt.s32.totalorder %s302_s12, %s302_s12 }
  0x1a   :  { %p238_p11 = scmp.ne.s32.totalorder %s302_s12, %s237_s30  ;;  %p243_p13 = scmp.lt.s32.totalorder %s237_s30, %s237_s30 }
  0x1c   :  { %p244_p0 = por %p243_p13, %p242_p12 }
  0x1e   :  { %p245_p1 = pnand %p244_p0, %p238_p11 }
  0x20   :  { %248 = shalt.err (!%p245_p1)
}
  0x21   :  { %s279_s0 = smov 128   ;;  %s280_s3 = smov 8  }
  0x22   :  { %31 = dma.hbm_to_vmem [thread:$0]  %s346_s1, 2176, %s302_s12, [#allocation6], %s279_s0, %s279_s0, %s280_s3  }
  0x23   :  { %271 = dma.done.wait [#allocation3], 128  }
  0x24   :  { %272 = vsyncadd [#allocation3], 4294967168 }
  0x25   :  { %273 = dma.done.wait [#allocation6], 2176  }
  0x26   :  { %274 = vsyncadd [#allocation6], 4294965120  ;;  %v55_v0 = vlaneseq  ;;  %v281_v1 = vmov 0.0|0.0   ;;  %vm77_vm0 = vcmask 64512   ;;  %v282_v3 = vmov 0.0   ;;  %v38_v5 = vld [vmem:[#allocation2] sm:$0xff] }
  0x27   :  { %171 = vmatprep.subr.bf16.mxu0 %v281_v1  ;;  %v60_v6 = vld [vmem:[#allocation5] sm:$0xff]  ;;  %v61_v7 = vld [vmem:[#allocation5 + $0x8] sm:$0xff]  ;;  %s283_s6 = smov 32   ;;  %s284_s7 = smov 96   ;;  %v62_v9 = vld [vmem:[#allocation5 + $0x10] sm:$0xff]  ;;  %vm49_vm2 = vcmask 261120  }
  0x28   :  { %v56_v2 = vand.u32 127, %v55_v0  ;;  %40 = vrot.lane.b32.xlu0 %v38_v5, %s283_s6  ;;  %46 = vrot.lane.b32.xlu1 %v38_v5, %s284_s7  ;;  %v172_v8 = vpack.c.bf16 %v61_v7, %v60_v6  ;;  %v63_v10 = vld [vmem:[#allocation5 + $0x18] sm:$0xff]  ;;  %v64_v12 = vld [vmem:[#allocation5 + $0x20] sm:$0xff]  ;;  %v65_v13 = vld [vmem:[#allocation5 + $0x28] sm:$0xff]  ;;  %s285_s1 = smov 64   ;;  %vm51_vm3 = vcmask 523264  }
  0x29   :  { %v175_v11 = vpack.c.bf16 %v63_v10, %v62_v9  ;;  %v178_v14 = vpack.c.bf16 %v65_v13, %v64_v12  ;;  %v66_v15 = vld [vmem:[#allocation5 + $0x30] sm:$0xff]  ;;  %v67_v16 = vld [vmem:[#allocation5 + $0x38] sm:$0xff]  ;;  %v68_v18 = vld [vmem:[#allocation5 + $0x40] sm:$0xff]  ;;  %vm53_vm4 = vcmask 785408   ;;  %s286_s8 = smov [#allocation7]  }
  0x2a   :  { %vm57_vm1 = vcmp.eq.s32.totalorder %v56_v2, 0  ;;  %173 = vmatpush1.bf16.msra.mxu0 %v172_v8  ;;  %v181_v17 = vpack.c.bf16 %v67_v16, %v66_v15  ;;  %v69_v19 = vld [vmem:[#allocation5 + $0x48] sm:$0xff]  ;;  %v70_v21 = vld [vmem:[#allocation5 + $0x50] sm:$0xff]  ;;  %v71_v22 = vld [vmem:[#allocation5 + $0x58] sm:$0xff]  ;;  %s159_s9 = sshll.u32 %s286_s8, 4  ;;  %s160_s9 = int_to_ptr.vmem [resolvable:$true] %s159_s9 }
  0x2b   :  { %v169_v4 = vsel %vm57_vm1, 1.0, %v282_v3  ;;  %174 = vmatprep.subr.bf16.mxu0 %v281_v1  ;;  %v184_v20 = vpack.c.bf16 %v69_v19, %v68_v18  ;;  %v187_v23 = vpack.c.bf16 %v71_v22, %v70_v21  ;;  %v72_v24 = vld [vmem:[#allocation5 + $0x60] sm:$0xff]  ;;  %v73_v25 = vld [vmem:[#allocation5 + $0x68] sm:$0xff]  ;;  %v74_v27 = vld [vmem:[#allocation5 + $0x70] sm:$0xff]  ;;  %s249_s10 = scalar_lea.vmem %s160_s9, 128  ;;  %p254_p3 = scmp.lt.s32.totalorder %s160_s9, %s160_s9 }
  0x2c   :  { %170 = vmatprep.mubr.msk.f32.mxu0 %vm77_vm0, %v169_v4  ;;  %43 = vrot.lane.b32.xlu0 %v38_v5, %s285_s1  ;;  %v190_v26 = vpack.c.bf16 %v73_v25, %v72_v24  ;;  %v75_v28 = vld [vmem:[#allocation5 + $0x78] sm:$0xff]  ;;  %v76_v30 = vld [vmem:[#allocation5 + $0x80] sm:$0xff]  ;;  %p250_p2 = scmp.ne.s32.totalorder %s160_s9, %s249_s10  ;;  %p255_p4 = scmp.lt.s32.totalorder %s249_s10, %s249_s10 }
  0x2d   :  { %v193_v29 = vpack.c.bf16 %v75_v28, %v74_v27 }
  0x2e   :  { %176 = vmatpush1.bf16.msra.mxu0 %v175_v11  ;;  %p256_p5 = por %p255_p4, %p254_p3 }
  0x2f   :  { %177 = vmatprep.subr.bf16.mxu0 %v281_v1 }
  0x30   :  { %p257_p6 = pnand %p256_p5, %p250_p2 }
  0x32   :  { %179 = vmatpush1.bf16.msra.mxu0 %v178_v14 }
  0x33   :  { %180 = vmatprep.subr.bf16.mxu0 %v281_v1 }
  0x36   :  { %182 = vmatpush1.bf16.msra.mxu0 %v181_v17 }
  0x37   :  { %183 = vmatprep.subr.bf16.mxu0 %v281_v1 }
  0x3a   :  { %185 = vmatpush1.bf16.msra.mxu0 %v184_v20 }
  0x3b   :  { %186 = vmatprep.subr.bf16.mxu0 %v281_v1 }
  0x3e   :  { %188 = vmatpush1.bf16.msra.mxu0 %v187_v23 }
  0x3f   :  { %189 = vmatprep.subr.bf16.mxu0 %v281_v1 }
  0x42   :  { %191 = vmatpush1.bf16.msra.mxu0 %v190_v26 }
  0x43   :  { %192 = vmatprep.subr.bf16.mxu0 %v281_v1 }
  0x46   :  { %194 = vmatpush1.bf16.msra.mxu0 %v193_v29 }
  0x47   :  { %113 = vmatprep.subr.mxu0 %v282_v3 }
  0x4a   :  { %114 = vmatpush1.msra.mxu0 %v76_v30 }
  0x9a   :  { %v41_v31 = vpop.permute.xlu0 %40  ;;  %v47_v32 = vpop.permute.xlu1 %46 }
  0x9b   :  { %v50_v33 = vsel %vm49_vm2, %v38_v5, %v41_v31 }
  0x9e   :  { %v44_v34 = vpop.permute.xlu0 %43 }
  0x9f   :  { %v52_v35 = vsel %vm51_vm3, %v50_v33, %v44_v34 }
  0xa0   :  { %v54_v36 = vsel %vm53_vm4, %v52_v35, %v47_v32 }
  0xa1   :  { %146 = vmatmul.mubr.f32.vlgmr.msra.gmra.mrb[0].mxu0 %v54_v36 }
 0x174   :  { %v147_v37 = vpop.f32.mrb[0].mxu0 }
 0x175   :  { %v151_v38 = vmul.f32 0.25, %v147_v37  ;;  %v149_v39 = vpop.f32.mrb[1].mxu0 }
 0x177   :  { %152 = vst [vmem:[#allocation7] sm:$0xff] %v151_v38 }
 0x178   :  { %260 = shalt.err (!%p257_p6)
}
 0x179   :  { %s261_s13 = scalar_lea.hbm %s347_s2, 128 }
 0x17a   :  { %p262_p7 = scmp.ne.s32.totalorder %s347_s2, %s261_s13  ;;  %p265_p8 = scmp.lt.u32.totalorder %s261_s13, %s347_s2 }
 0x17c   :  { %p267_p9 = pnand %p265_p8, %p262_p7 }
 0x17e   :  { %270 = shalt.err (!%p267_p9)
}
 0x17f   :  { %162 = dma.vmem_to_hbm [thread:$0]  %s160_s9, 128, %s347_s2, [#allocation4]  }
 0x180   :  { %275 = dma.done.wait [#allocation4], 128  }
 0x181   :  { %276 = vsyncadd [#allocation4], 4294967168 }
 0x182   :  { %166 = vsyncpa [#allocation3], 1 }
 0x183   :  { %167 = vsyncpa [#allocation6], 1 }
 0x184   :  { %168 = vsyncpa [#allocation4], 1 }

</bundles_post_ra>
